<compile_context>
chip_gen: v6e
topology: v6e:2x2x1
jax: 0.10.0
libtpu: 0.0.40
codegen_flags: <defaults>
</compile_context>

<pallas_src>
import jax
import jax.numpy as jnp
from jax.experimental import pallas as pl
from jax.experimental.pallas import tpu as pltpu


def _round_up(x, m):
    return ((x + m - 1) // m) * m


def _pad2d(a, rows, cols):
    r, c = a.shape
    return jnp.pad(a, ((0, rows - r), (0, cols - c)))


def _make_kernel(n_layers):
    """Kernel: PCA-project (tiled reduction over input_dim), then run the MLP."""

    def kernel(*refs):
        x_ref, mean_ref, comp_ref = refs[:3]
        wb = refs[3:3 + 2 * n_layers]          # (W, b) pairs, [in, out] layout
        out_ref = refs[3 + 2 * n_layers]
        acc_ref = refs[3 + 2 * n_layers + 1]   # VMEM scratch: x_pca accumulator

        k = pl.program_id(1)

        @pl.when(k == 0)
        def _():
            acc_ref[...] = jnp.zeros_like(acc_ref)

        # Center this chunk of x and accumulate its PCA-projection contribution.
        xc = x_ref[...] - mean_ref[...]                        # [TB, tk] (VPU)
        acc_ref[...] += jnp.dot(xc, comp_ref[...],             # [TB, C_pad] (MXU)
                                preferred_element_type=jnp.float32)

        # On the last reduction step, run the (small, VMEM-resident) MLP.
        @pl.when(k == pl.num_programs(1) - 1)
        def _():
            h = acc_ref[...]                                   # [TB, C_pad]
            for i in range(n_layers):
                w = wb[2 * i][...]
                b = wb[2 * i + 1][...]
                h = jnp.dot(h, w, preferred_element_type=jnp.float32) + b
                if i < n_layers - 1:
                    h = jnp.maximum(h, 0.0)
            out_ref[...] = h

    return kernel


def _choose_tk(D, C_pad, TB, tk_override=None):
    """Reduction-tile size: fill ~20 MiB with the two double-buffered streams."""
    if tk_override is not None:
        return max(128, _round_up(tk_override, 128))
    budget = 20 * 1024 * 1024
    per_tk_bytes = 2 * 4 * (C_pad + TB + 1)      # comp + x + mean, double-buffered
    tk = (budget // per_tk_bytes) // 128 * 128
    tk = max(128, min(8192, tk))
    return min(tk, _round_up(D, 128))


def pca_mlp_forward(x, mean, components, mlp_params, output_dim, tk_override=None):
    """Fused PCA + MLP forward.

    x:          [B, D] float32
    mean:       [D]    float32
    components: [D, C] float32
    mlp_params: list of (W [in, out], b [out]) with ReLU between all but last.
    returns:    [B, output_dim] float32
    """
    B, D = x.shape
    C = components.shape[1]
    n_layers = len(mlp_params)

    # --- lane/sublane-friendly padded dims --------------------------------
    TB = min(_round_up(B, 8), 128)               # batch tile (sublane multiple)
    B_pad = _round_up(B, TB)
    C_pad = _round_up(C, 128)

    tk = _choose_tk(D, C_pad, TB, tk_override)
    D_pad = _round_up(D, tk)

    # --- zero-pad operands (zeros are mathematically inert here) ----------
    x_p = _pad2d(x.astype(jnp.float32), B_pad, D_pad)
    mean_p = _pad2d(mean.reshape(1, -1).astype(jnp.float32), 1, D_pad)
    comp_p = _pad2d(components.astype(jnp.float32), D_pad, C_pad)

    padded_wb = []
    prev_pad = C_pad
    for (w, b) in mlp_params:
        out_p = _round_up(w.shape[1], 128)
        padded_wb.append(_pad2d(w.astype(jnp.float32), prev_pad, out_p))
        padded_wb.append(_pad2d(b.reshape(1, -1).astype(jnp.float32), 1, out_p))
        prev_pad = out_p
    O_pad = prev_pad

    # --- grid & specs ------------------------------------------------------
    grid = (B_pad // TB, D_pad // tk)

    in_specs = [
        pl.BlockSpec((TB, tk), lambda i, k: (i, k)),       # x tile
        pl.BlockSpec((1, tk), lambda i, k: (0, k)),        # mean tile
        pl.BlockSpec((tk, C_pad), lambda i, k: (k, 0)),    # components tile
    ]
    for li in range(n_layers):
        w_shape = padded_wb[2 * li].shape
        b_shape = padded_wb[2 * li + 1].shape
        # Constant block index -> DMA'd once, resident across the whole grid.
        in_specs.append(pl.BlockSpec(w_shape, lambda i, k: (0, 0)))
        in_specs.append(pl.BlockSpec(b_shape, lambda i, k: (0, 0)))

    out_spec = pl.BlockSpec((TB, O_pad), lambda i, k: (i, 0))

    out = pl.pallas_call(
        _make_kernel(n_layers),
        out_shape=jax.ShapeDtypeStruct((B_pad, O_pad), jnp.float32),
        grid=grid,
        in_specs=in_specs,
        out_specs=out_spec,
        scratch_shapes=[pltpu.VMEM((TB, C_pad), jnp.float32)],
        compiler_params=pltpu.CompilerParams(
            dimension_semantics=("parallel", "arbitrary"),
            vmem_limit_bytes=32 * 1024 * 1024),
    )(x_p, mean_p, comp_p, *padded_wb)

    return out[:B, :output_dim]


class PCAPlusMLPBaseline:
    """JAX/Pallas port of the PyTorch PCAPlusMLPBaseline (forward pass)."""

    def __init__(self, input_dim, pca_components, hidden_dims, output_dim, key):
        self.input_dim = input_dim
        self.pca_components = pca_components
        self.hidden_dims = list(hidden_dims)
        self.output_dim = output_dim

        # Buffers (same defaults as the torch module).
        self.mean = jnp.zeros((input_dim,), jnp.float32)
        self.components = jnp.eye(input_dim, pca_components, dtype=jnp.float32)

        # MLP params, stored as [in_features, out_features] so y = x @ W + b.
        self.mlp_params = []
        prev = pca_components
        for d in list(hidden_dims) + [output_dim]:
            key, kw, kb = jax.random.split(key, 3)
            bound = 1.0 / (prev ** 0.5)
            w = jax.random.uniform(kw, (prev, d), jnp.float32, -bound, bound)
            b = jax.random.uniform(kb, (d,), jnp.float32, -bound, bound)
            self.mlp_params.append((w, b))
            prev = d

    def fit_pca(self, data):
        # TODO(synk): SVD-based PCA fit stays in plain JAX (one-time setup,
        # not part of the forward pass; no Pallas equivalent needed).
        self.mean = data.mean(axis=0)
        xc = data - self.mean
        _, _, vh = jnp.linalg.svd(xc, full_matrices=False)
        self.components = vh[: self.pca_components, :].T

    def __call__(self, x, tk_override=None):
        return pca_mlp_forward(x, self.mean, self.components,
                               self.mlp_params, self.output_dim,
                               tk_override=tk_override)

    def reference(self, x):
        """Pure-JAX reference of the same forward pass (for verification)."""
        h = (x - self.mean) @ self.components
        n = len(self.mlp_params)
        for i, (w, b) in enumerate(self.mlp_params):
            h = h @ w + b
            if i < n - 1:
                h = jnp.maximum(h, 0.0)
        return h


def _run_case(key, batch_size, input_dim, pca_components, hidden_dims,
              output_dim, tk_override=None):
    key, kx, kp, km, kc = jax.random.split(key, 5)
    model = PCAPlusMLPBaseline(input_dim, pca_components, hidden_dims,
                               output_dim, kp)
    # Give the PCA buffers non-trivial values so the test is meaningful.
    model.mean = jax.random.normal(km, (input_dim,), jnp.float32)
    model.components = (jax.random.normal(kc, (input_dim, pca_components),
                                          jnp.float32) / (input_dim ** 0.5))
    x = jax.random.normal(kx, (batch_size, input_dim), jnp.float32)

    out = jax.block_until_ready(model(x, tk_override=tk_override))
    ref = model.reference(x)
    assert out.shape == (batch_size, output_dim), out.shape
    assert jnp.allclose(out, ref, atol=1e-4, rtol=1e-4), float(
        jnp.max(jnp.abs(out - ref)))


if __name__ == "__main__":
    key = jax.random.PRNGKey(0)
    k1, k2 = jax.random.split(key)

    # Case 1: small, non-128-multiple dims; single reduction step.
    _run_case(k1, batch_size=2, input_dim=96, pca_components=24,
              hidden_dims=[64, 32], output_dim=16)

    # Case 2: forces tk=128 so the tiled reduction over input_dim actually
    # iterates (grid k = 3), exercising the accumulator init/finalize path.
    _run_case(k2, batch_size=2, input_dim=384, pca_components=24,
              hidden_dims=[64, 32], output_dim=16, tk_override=128)

    print("KERNEL_OK")
</pallas_src>

<mosaic_0001>
module attributes {stable_mosaic.version = 11 : i64} {
  func.func @kernel(%arg0: i32, %arg1: i32, %arg2: memref<8x128xf32, #tpu.memory_space<vmem>>, %arg3: memref<1x128xf32, #tpu.memory_space<vmem>>, %arg4: memref<128x128xf32, #tpu.memory_space<vmem>>, %arg5: memref<128x128xf32, #tpu.memory_space<vmem>>, %arg6: memref<1x128xf32, #tpu.memory_space<vmem>>, %arg7: memref<128x128xf32, #tpu.memory_space<vmem>>, %arg8: memref<1x128xf32, #tpu.memory_space<vmem>>, %arg9: memref<128x128xf32, #tpu.memory_space<vmem>>, %arg10: memref<1x128xf32, #tpu.memory_space<vmem>>, %arg11: memref<8x128xf32, #tpu.memory_space<vmem>>, %arg12: memref<8x128xf32, #tpu.memory_space<vmem>>) attributes {dimension_semantics = [#tpu.dimension_semantics<parallel>, #tpu.dimension_semantics<arbitrary>], iteration_bounds = array<i64: 1, 1>, scalar_prefetch = 0 : i64, scratch_operands = 1 : i64, tpu.core_type = #tpu.core_type<tc>, window_params = [{transform_indices = @transform_0, window_bounds = array<i64: 8, 128>}, {transform_indices = @transform_1, window_bounds = array<i64: 1, 128>}, {transform_indices = @transform_2, window_bounds = array<i64: 128, 128>}, {pipeline_mode = #tpu.pipeline_mode<synchronous>, transform_indices = @transform_3, window_bounds = array<i64: 128, 128>}, {pipeline_mode = #tpu.pipeline_mode<synchronous>, transform_indices = @transform_4, window_bounds = array<i64: 1, 128>}, {pipeline_mode = #tpu.pipeline_mode<synchronous>, transform_indices = @transform_5, window_bounds = array<i64: 128, 128>}, {pipeline_mode = #tpu.pipeline_mode<synchronous>, transform_indices = @transform_6, window_bounds = array<i64: 1, 128>}, {pipeline_mode = #tpu.pipeline_mode<synchronous>, transform_indices = @transform_7, window_bounds = array<i64: 128, 128>}, {pipeline_mode = #tpu.pipeline_mode<synchronous>, transform_indices = @transform_8, window_bounds = array<i64: 1, 128>}, {transform_indices = @transform_9, window_bounds = array<i64: 8, 128>}]} {
    %c0_i32 = arith.constant 0 : i32
    %0 = arith.cmpi eq, %arg1, %c0_i32 : i32
    %1 = arith.extui %0 : i1 to i32
    %c0_i32_0 = arith.constant 0 : i32
    %2 = arith.cmpi ne, %1, %c0_i32_0 : i32
    scf.if %2 {
      %cst_12 = arith.constant 0.000000e+00 : f32
      %15 = vector.broadcast %cst_12 : f32 to vector<8x128xf32>
      %c0_13 = arith.constant 0 : index
      %c0_14 = arith.constant 0 : index
      %16 = vector.load %arg12[%c0_13, %c0_14] : memref<8x128xf32, #tpu.memory_space<vmem>>, vector<8x128xf32>
      tpu.vector_store %arg12[%c0_13, %c0_14], %15 {strides = array<i32>} : memref<8x128xf32, #tpu.memory_space<vmem>>, vector<8x128xf32>,
    } else {
    }
    %c0 = arith.constant 0 : index
    %c0_1 = arith.constant 0 : index
    %3 = vector.load %arg2[%c0, %c0_1] : memref<8x128xf32, #tpu.memory_space<vmem>>, vector<8x128xf32>
    %c0_2 = arith.constant 0 : index
    %c0_3 = arith.constant 0 : index
    %4 = vector.load %arg3[%c0_2, %c0_3] : memref<1x128xf32, #tpu.memory_space<vmem>>, vector<1x128xf32>
    %5 = vector.broadcast %4 : vector<1x128xf32> to vector<8x128xf32>
    %6 = arith.subf %3, %5 : vector<8x128xf32>
    %c0_4 = arith.constant 0 : index
    %c0_5 = arith.constant 0 : index
    %7 = vector.load %arg12[%c0_4, %c0_5] : memref<8x128xf32, #tpu.memory_space<vmem>>, vector<8x128xf32>
    %c0_6 = arith.constant 0 : index
    %c0_7 = arith.constant 0 : index
    %8 = vector.load %arg4[%c0_6, %c0_7] : memref<128x128xf32, #tpu.memory_space<vmem>>, vector<128x128xf32>
    %cst = arith.constant dense<0.000000e+00> : vector<8x128xf32>
    %9 = tpu.matmul %6, %8, %cst {dimension_numbers = #tpu.dot_dimension_numbers<[1], [0], [0], [1], [0, 0, 1, 1], [], []>} : vector<8x128xf32>, vector<128x128xf32>, vector<8x128xf32> -> vector<8x128xf32>
    %10 = arith.addf %7, %9 : vector<8x128xf32>
    %c0_8 = arith.constant 0 : index
    %c0_9 = arith.constant 0 : index
    %11 = vector.load %arg12[%c0_8, %c0_9] : memref<8x128xf32, #tpu.memory_space<vmem>>, vector<8x128xf32>
    tpu.vector_store %arg12[%c0_8, %c0_9], %10 {strides = array<i32>} : memref<8x128xf32, #tpu.memory_space<vmem>>, vector<8x128xf32>,
    %c0_i32_10 = arith.constant 0 : i32
    %12 = arith.cmpi eq, %arg1, %c0_i32_10 : i32
    %13 = arith.extui %12 : i1 to i32
    %c0_i32_11 = arith.constant 0 : i32
    %14 = arith.cmpi ne, %13, %c0_i32_11 : i32
    scf.if %14 {
      %c0_12 = arith.constant 0 : index
      %c0_13 = arith.constant 0 : index
      %15 = vector.load %arg12[%c0_12, %c0_13] : memref<8x128xf32, #tpu.memory_space<vmem>>, vector<8x128xf32>
      %c0_14 = arith.constant 0 : index
      %c0_15 = arith.constant 0 : index
      %16 = vector.load %arg5[%c0_14, %c0_15] : memref<128x128xf32, #tpu.memory_space<vmem>>, vector<128x128xf32>
      %c0_16 = arith.constant 0 : index
      %c0_17 = arith.constant 0 : index
      %17 = vector.load %arg6[%c0_16, %c0_17] : memref<1x128xf32, #tpu.memory_space<vmem>>, vector<1x128xf32>
      %cst_18 = arith.constant dense<0.000000e+00> : vector<8x128xf32>
      %18 = tpu.matmul %15, %16, %cst_18 {dimension_numbers = #tpu.dot_dimension_numbers<[1], [0], [0], [1], [0, 0, 1, 1], [], []>} : vector<8x128xf32>, vector<128x128xf32>, vector<8x128xf32> -> vector<8x128xf32>
      %19 = vector.broadcast %17 : vector<1x128xf32> to vector<8x128xf32>
      %20 = arith.addf %18, %19 : vector<8x128xf32>
      %cst_19 = arith.constant 0.000000e+00 : f32
      %21 = vector.broadcast %cst_19 : f32 to vector<8x128xf32>
      %22 = arith.maximumf %20, %21 : vector<8x128xf32>
      %c0_20 = arith.constant 0 : index
      %c0_21 = arith.constant 0 : index
      %23 = vector.load %arg7[%c0_20, %c0_21] : memref<128x128xf32, #tpu.memory_space<vmem>>, vector<128x128xf32>
      %c0_22 = arith.constant 0 : index
      %c0_23 = arith.constant 0 : index
      %24 = vector.load %arg8[%c0_22, %c0_23] : memref<1x128xf32, #tpu.memory_space<vmem>>, vector<1x128xf32>
      %cst_24 = arith.constant dense<0.000000e+00> : vector<8x128xf32>
      %25 = tpu.matmul %22, %23, %cst_24 {dimension_numbers = #tpu.dot_dimension_numbers<[1], [0], [0], [1], [0, 0, 1, 1], [], []>} : vector<8x128xf32>, vector<128x128xf32>, vector<8x128xf32> -> vector<8x128xf32>
      %26 = vector.broadcast %24 : vector<1x128xf32> to vector<8x128xf32>
      %27 = arith.addf %25, %26 : vector<8x128xf32>
      %cst_25 = arith.constant 0.000000e+00 : f32
      %28 = vector.broadcast %cst_25 : f32 to vector<8x128xf32>
      %29 = arith.maximumf %27, %28 : vector<8x128xf32>
      %c0_26 = arith.constant 0 : index
      %c0_27 = arith.constant 0 : index
      %30 = vector.load %arg9[%c0_26, %c0_27] : memref<128x128xf32, #tpu.memory_space<vmem>>, vector<128x128xf32>
      %c0_28 = arith.constant 0 : index
      %c0_29 = arith.constant 0 : index
      %31 = vector.load %arg10[%c0_28, %c0_29] : memref<1x128xf32, #tpu.memory_space<vmem>>, vector<1x128xf32>
      %cst_30 = arith.constant dense<0.000000e+00> : vector<8x128xf32>
      %32 = tpu.matmul %29, %30, %cst_30 {dimension_numbers = #tpu.dot_dimension_numbers<[1], [0], [0], [1], [0, 0, 1, 1], [], []>} : vector<8x128xf32>, vector<128x128xf32>, vector<8x128xf32> -> vector<8x128xf32>
      %33 = vector.broadcast %31 : vector<1x128xf32> to vector<8x128xf32>
      %34 = arith.addf %32, %33 : vector<8x128xf32>
      %c0_31 = arith.constant 0 : index
      %c0_32 = arith.constant 0 : index
      %35 = vector.load %arg11[%c0_31, %c0_32] : memref<8x128xf32, #tpu.memory_space<vmem>>, vector<8x128xf32>
      tpu.vector_store %arg11[%c0_31, %c0_32], %34 {strides = array<i32>} : memref<8x128xf32, #tpu.memory_space<vmem>>, vector<8x128xf32>,
    } else {
    }
    return
  }
  func.func @transform_0(%arg0: i32, %arg1: i32) -> (i32, i32) {
    %c0_i32 = arith.constant 0 : i32
    return %arg0, %arg1 : i32, i32
  }
  func.func @transform_1(%arg0: i32, %arg1: i32) -> (i32, i32) {
    %c0_i32 = arith.constant 0 : i32
    %c0_i32_0 = arith.constant 0 : i32
    return %c0_i32, %arg1 : i32, i32
  }
  func.func @transform_2(%arg0: i32, %arg1: i32) -> (i32, i32) {
    %c0_i32 = arith.constant 0 : i32
    %c0_i32_0 = arith.constant 0 : i32
    return %arg1, %c0_i32 : i32, i32
  }
  func.func @transform_3(%arg0: i32, %arg1: i32) -> (i32, i32) {
    %c0_i32 = arith.constant 0 : i32
    %c0_i32_0 = arith.constant 0 : i32
    %c0_i32_1 = arith.constant 0 : i32
    return %c0_i32, %c0_i32_0 : i32, i32
  }
  func.func @transform_4(%arg0: i32, %arg1: i32) -> (i32, i32) {
    %c0_i32 = arith.constant 0 : i32
    %c0_i32_0 = arith.constant 0 : i32
    %c0_i32_1 = arith.constant 0 : i32
    return %c0_i32, %c0_i32_0 : i32, i32
  }
  func.func @transform_5(%arg0: i32, %arg1: i32) -> (i32, i32) {
    %c0_i32 = arith.constant 0 : i32
    %c0_i32_0 = arith.constant 0 : i32
    %c0_i32_1 = arith.constant 0 : i32
    return %c0_i32, %c0_i32_0 : i32, i32
  }
  func.func @transform_6(%arg0: i32, %arg1: i32) -> (i32, i32) {
    %c0_i32 = arith.constant 0 : i32
    %c0_i32_0 = arith.constant 0 : i32
    %c0_i32_1 = arith.constant 0 : i32
    return %c0_i32, %c0_i32_0 : i32, i32
  }
  func.func @transform_7(%arg0: i32, %arg1: i32) -> (i32, i32) {
    %c0_i32 = arith.constant 0 : i32
    %c0_i32_0 = arith.constant 0 : i32
    %c0_i32_1 = arith.constant 0 : i32
    return %c0_i32, %c0_i32_0 : i32, i32
  }
  func.func @transform_8(%arg0: i32, %arg1: i32) -> (i32, i32) {
    %c0_i32 = arith.constant 0 : i32
    %c0_i32_0 = arith.constant 0 : i32
    %c0_i32_1 = arith.constant 0 : i32
    return %c0_i32, %c0_i32_0 : i32, i32
  }
  func.func @transform_9(%arg0: i32, %arg1: i32) -> (i32, i32) {
    %c0_i32 = arith.constant 0 : i32
    %c0_i32_0 = arith.constant 0 : i32
    return %arg0, %c0_i32 : i32, i32
  }
}

</mosaic_0001>

<bundles_post_ra>
// kernel: tpu_custom_call.1
= control target key start
LH: loop header
LB: loop body
LE: loop exit
PB: predicated region body
PF: predicated region fallthrough
CT: control target
= control target key end

     0   :  { %14 = vsyncpa [#allocation4], 0  ;;  %s1029_s0 = inlined_call_operand.hbm [shape: f32[8,128], index: 0, kind: input, shape index: {}]   ;;  %s1030_s1 = inlined_call_operand.vmem [shape: f32[1,128], index: 1, kind: input, shape index: {}]   ;;  %s1031_s2 = inlined_call_operand.hbm [shape: f32[128,128], index: 2, kind: input, shape index: {}]   ;;  %s1032_s3 = inlined_call_operand.hbm [shape: f32[128,128], index: 3, kind: input, shape index: {}]   ;;  %s1033_s4 = inlined_call_operand.vmem [shape: f32[1,128], index: 4, kind: input, shape index: {}]   ;;  %s1034_s5 = inlined_call_operand.hbm [shape: f32[128,128], index: 5, kind: input, shape index: {}]   ;;  %s1035_s6 = inlined_call_operand.vmem [shape: f32[1,128], index: 6, kind: input, shape index: {}]   ;;  %s1036_s7 = inlined_call_operand.hbm [shape: f32[128,128], index: 7, kind: input, shape index: {}]   ;;  %s1037_s8 = inlined_call_operand.vmem [shape: f32[1,128], index: 8, kind: input, shape index: {}]   ;;  %s1038_s9 = inlined_call_operand.hbm [shape: f32[8,128], index: 9, kind: output, shape index: {}]  }
   0x1   :  { %15 = vsyncpa [#allocation7], 0 }
   0x2   :  { %16 = vsyncpa [#allocation10], 0 }
   0x3   :  { %17 = vsyncpa [#allocation5], 0  ;;  %s855_s30 = smov [#allocation6]  }
   0x4   :  { %s35_s10 = sshll.u32 %s855_s30, 4  ;;  %s36_s10 = int_to_ptr.vmem [resolvable:$true] %s35_s10 }
   0x5   :  { %s735_s11 = scalar_lea.vmem %s36_s10, 2048  ;;  %p740_p1 = scmp.lt.s32.totalorder %s36_s10, %s36_s10 }
   0x6   :  { %p736_p0 = scmp.ne.s32.totalorder %s36_s10, %s735_s11  ;;  %p741_p2 = scmp.lt.s32.totalorder %s735_s11, %s735_s11 }
   0x8   :  { %p742_p3 = por %p741_p2, %p740_p1 }
   0xa   :  { %p743_p4 = pnand %p742_p3, %p736_p0 }
   0xc   :  { %746 = shalt.err (!%p743_p4)
}
   0xd   :  { %s856_s12 = smov 128   ;;  %s857_s13 = smov 8  }
   0xe   :  { %41 = dma.hbm_to_vmem [thread:$0]  %s1031_s2, 2048, %s36_s10, [#allocation7], %s856_s12, %s856_s12, %s857_s13  }
   0xf   :  { %s858_s16 = smov [#allocation9]   ;;  %s859_s18 = smov [#allocation3]  }
  0x10   :  { %s61_s17 = sshll.u32 %s858_s16, 4  ;;  %s24_s19 = sshll.u32 %s859_s18, 4  ;;  %s62_s17 = int_to_ptr.vmem [resolvable:$true] %s61_s17  ;;  %s25_s19 = int_to_ptr.vmem [resolvable:$true] %s24_s19 }
  0x11   :  { %s755_s20 = scalar_lea.vmem %s62_s17, 2048  ;;  %p760_p6 = scmp.lt.s32.totalorder %s62_s17, %s62_s17 }
  0x12   :  { %p756_p5 = scmp.ne.s32.totalorder %s62_s17, %s755_s20  ;;  %p761_p7 = scmp.lt.s32.totalorder %s755_s20, %s755_s20 }
  0x14   :  { %p762_p8 = por %p761_p7, %p760_p6 }
  0x16   :  { %p763_p9 = pnand %p762_p8, %p756_p5 }
  0x18   :  { %766 = shalt.err (!%p763_p9)
}
  0x19   :  { %67 = dma.hbm_to_vmem [thread:$0]  %s1034_s5, 2048, %s62_s17, [#allocation10], %s856_s12, %s856_s12, %s857_s13  }
  0x1a   :  { %s775_s2 = scalar_lea.vmem %s25_s19, 128  ;;  %p780_p11 = scmp.lt.s32.totalorder %s25_s19, %s25_s19 }
  0x1b   :  { %p776_p10 = scmp.ne.s32.totalorder %s25_s19, %s775_s2  ;;  %p781_p12 = scmp.lt.s32.totalorder %s775_s2, %s775_s2 }
  0x1d   :  { %p782_p13 = por %p781_p12, %p780_p11 }
  0x1f   :  { %p783_p0 = pnand %p782_p13, %p776_p10 }
  0x21   :  { %786 = shalt.err (!%p783_p0)
}
  0x22   :  { %27 = dma.hbm_to_vmem [thread:$0]  %s1029_s0, 128, %s25_s19, [#allocation4]  }
  0x23   :  { %s860_s25 = smov [#allocation8]   ;;  %s861_s27 = smov [#allocation11]  }
  0x24   :  { %s47_s26 = sshll.u32 %s860_s25, 4  ;;  %s75_s28 = sshll.u32 %s861_s27, 4  ;;  %s48_s26 = int_to_ptr.vmem [resolvable:$true] %s47_s26  ;;  %s76_s28 = int_to_ptr.vmem [resolvable:$true] %s75_s28 }
  0x25   :  { %s795_s29 = scalar_lea.vmem %s48_s26, 2048  ;;  %p800_p2 = scmp.lt.s32.totalorder %s48_s26, %s48_s26 }
  0x26   :  { %p796_p1 = scmp.ne.s32.totalorder %s48_s26, %s795_s29  ;;  %p801_p3 = scmp.lt.s32.totalorder %s795_s29, %s795_s29 }
  0x28   :  { %p802_p4 = por %p801_p3, %p800_p2 }
  0x2a   :  { %p803_p5 = pnand %p802_p4, %p796_p1 }
  0x2c   :  { %806 = shalt.err (!%p803_p5)
}
  0x2d   :  { %53 = dma.hbm_to_vmem [thread:$0]  %s1032_s3, 2048, %s48_s26, [#allocation7], %s856_s12, %s856_s12, %s857_s13  }
  0x2e   :  { %s815_s0 = scalar_lea.vmem %s76_s28, 2048  ;;  %p820_p7 = scmp.lt.s32.totalorder %s76_s28, %s76_s28 }
  0x2f   :  { %p816_p6 = scmp.ne.s32.totalorder %s76_s28, %s815_s0  ;;  %p821_p8 = scmp.lt.s32.totalorder %s815_s0, %s815_s0 }
  0x31   :  { %p822_p9 = por %p821_p8, %p820_p7 }
  0x33   :  { %p823_p10 = pnand %p822_p9, %p816_p6 }
  0x35   :  { %826 = shalt.err (!%p823_p10)
}
  0x36   :  { %81 = dma.hbm_to_vmem [thread:$0]  %s1036_s7, 2048, %s76_s28, [#allocation10], %s856_s12, %s856_s12, %s857_s13  }
  0x37   :  { %847 = dma.done.wait [#allocation4], 128  }
  0x38   :  { %848 = vsyncadd [#allocation4], 4294967168 }
  0x39   :  { %849 = dma.done.wait [#allocation7], 4096  }
  0x3a   :  { %850 = vsyncadd [#allocation7], 4294963200 }
  0x3b   :  { %851 = dma.done.wait [#allocation10], 4096  }
  0x3c   :  { %852 = vsyncadd [#allocation10], 4294963200  ;;  %v862_v0 = vmov 0.0   ;;  %vm863_vm0 = vmmov 0   ;;  %v129_v1 = vld [vmem:[#allocation6 + $0x78] sm:$0xff]  ;;  %v128_v2 = vld [vmem:[#allocation6 + $0x70] sm:$0xff] }
  0x3d   :  { %577 = vmatprep.subr.mxu0 %v862_v0  ;;  %609 = vmatprep.mubr.msk.f32.mxu0 %vm863_vm0, %v862_v0  ;;  %v127_v3 = vld [vmem:[#allocation6 + $0x68] sm:$0xff]  ;;  %v126_v4 = vld [vmem:[#allocation6 + $0x60] sm:$0xff]  ;;  %v125_v5 = vld [vmem:[#allocation6 + $0x58] sm:$0xff]  ;;  %s864_s16 = smov [#allocation12]  }
  0x3e   :  { %612 = vmatprep.subr.mxu1 %v862_v0  ;;  %644 = vmatprep.mubr.msk.f32.mxu1 %vm863_vm0, %v862_v0  ;;  %v221_v6 = vld [vmem:[#allocation8 + $0x78] sm:$0xff]  ;;  %v220_v7 = vld [vmem:[#allocation8 + $0x70] sm:$0xff]  ;;  %v219_v9 = vld [vmem:[#allocation8 + $0x68] sm:$0xff]  ;;  %s494_s17 = sshll.u32 %s864_s16, 4  ;;  %s495_s17 = int_to_ptr.vmem [resolvable:$true] %s494_s17 }
  0x3f   :  { %578 = vmatpush3.msra.mxu0 %v129_v1  ;;  %613 = vmatpush3.msra.mxu1 %v221_v6  ;;  %v124_v8 = vld [vmem:[#allocation6 + $0x50] sm:$0xff]  ;;  %v123_v10 = vld [vmem:[#allocation6 + $0x48] sm:$0xff]  ;;  %v218_v11 = vld [vmem:[#allocation8 + $0x60] sm:$0xff]  ;;  %s827_s18 = scalar_lea.vmem %s495_s17, 128  ;;  %p832_p12 = scmp.lt.s32.totalorder %s495_s17, %s495_s17 }
  0x40   :  { %579 = vmatprep.subr.mxu0 %v862_v0  ;;  %614 = vmatprep.subr.mxu1 %v862_v0  ;;  %v122_v12 = vld [vmem:[#allocation6 + $0x40] sm:$0xff]  ;;  %v217_v13 = vld [vmem:[#allocation8 + $0x58] sm:$0xff]  ;;  %v216_v15 = vld [vmem:[#allocation8 + $0x50] sm:$0xff]  ;;  %p828_p11 = scmp.ne.s32.totalorder %s495_s17, %s827_s18  ;;  %p833_p13 = scmp.lt.s32.totalorder %s827_s18, %s827_s18 }
  0x41   :  { %580 = vmatpush3.msra.mxu0 %v128_v2  ;;  %615 = vmatpush3.msra.mxu1 %v220_v7  ;;  %v121_v14 = vld [vmem:[#allocation6 + $0x38] sm:$0xff]  ;;  %v120_v16 = vld [vmem:[#allocation6 + $0x30] sm:$0xff]  ;;  %v215_v17 = vld [vmem:[#allocation8 + $0x48] sm:$0xff] }
  0x42   :  { %581 = vmatprep.subr.mxu0 %v862_v0  ;;  %616 = vmatprep.subr.mxu1 %v862_v0  ;;  %v119_v18 = vld [vmem:[#allocation6 + $0x28] sm:$0xff]  ;;  %v214_v19 = vld [vmem:[#allocation8 + $0x40] sm:$0xff]  ;;  %v213_v21 = vld [vmem:[#allocation8 + $0x38] sm:$0xff]  ;;  %p834_p0 = por %p833_p13, %p832_p12 }
  0x43   :  { %582 = vmatpush3.msra.mxu0 %v127_v3  ;;  %617 = vmatpush3.msra.mxu1 %v219_v9  ;;  %v118_v20 = vld [vmem:[#allocation6 + $0x20] sm:$0xff]  ;;  %v117_v22 = vld [vmem:[#allocation6 + $0x18] sm:$0xff]  ;;  %v212_v23 = vld [vmem:[#allocation8 + $0x30] sm:$0xff] }
  0x44   :  { %583 = vmatprep.subr.mxu0 %v862_v0  ;;  %618 = vmatprep.subr.mxu1 %v862_v0  ;;  %v116_v24 = vld [vmem:[#allocation6 + $0x10] sm:$0xff]  ;;  %v211_v25 = vld [vmem:[#allocation8 + $0x28] sm:$0xff]  ;;  %v104_v26 = vld [vmem:[#allocation3] sm:$0xff]  ;;  %p835_p1 = pnand %p834_p0, %p828_p11 }
  0x45   :  { %584 = vmatpush3.msra.mxu0 %v126_v4  ;;  %619 = vmatpush3.msra.mxu1 %v218_v11  ;;  %v505_v27 = vld [vmem:[%s1030_s1] ss:$0 sm:$0xff]  ;;  %v115_v28 = vld [vmem:[#allocation6 + $0x8] sm:$0xff]  ;;  %v210_v29 = vld [vmem:[#allocation8 + $0x20] sm:$0xff] }
  0x46   :  { %585 = vmatprep.subr.mxu0 %v862_v0  ;;  %620 = vmatprep.subr.mxu1 %v862_v0  ;;  %v114_v30 = vld [vmem:[#allocation6] sm:$0xff]  ;;  %v112_v31 = vsub.f32 %v104_v26, %v505_v27  ;;  %v209_v32 = vld [vmem:[#allocation8 + $0x18] sm:$0xff]  ;;  %v208_v33 = vld [vmem:[#allocation8 + $0x10] sm:$0xff] }
  0x47   :  { %586 = vmatpush3.msra.mxu0 %v125_v5  ;;  %621 = vmatpush3.msra.mxu1 %v217_v13  ;;  %v207_v34 = vld [vmem:[#allocation8 + $0x8] sm:$0xff]  ;;  %v206_v35 = vld [vmem:[#allocation8] sm:$0xff]  ;;  %v315_v36 = vld [vmem:[#allocation9 + $0x78] sm:$0xff] }
  0x48   :  { %587 = vmatprep.subr.mxu0 %v862_v0  ;;  %622 = vmatprep.subr.mxu1 %v862_v0  ;;  %v314_v37 = vld [vmem:[#allocation9 + $0x70] sm:$0xff]  ;;  %v313_v38 = vld [vmem:[#allocation9 + $0x68] sm:$0xff]  ;;  %v312_v39 = vld [vmem:[#allocation9 + $0x60] sm:$0xff] }
  0x49   :  { %588 = vmatpush3.msra.mxu0 %v124_v8  ;;  %623 = vmatpush3.msra.mxu1 %v216_v15  ;;  %v311_v40 = vld [vmem:[#allocation9 + $0x58] sm:$0xff]  ;;  %v310_v41 = vld [vmem:[#allocation9 + $0x50] sm:$0xff]  ;;  %v309_v42 = vld [vmem:[#allocation9 + $0x48] sm:$0xff] }
  0x4a   :  { %589 = vmatprep.subr.mxu0 %v862_v0  ;;  %624 = vmatprep.subr.mxu1 %v862_v0  ;;  %v308_v43 = vld [vmem:[#allocation9 + $0x40] sm:$0xff]  ;;  %v307_v44 = vld [vmem:[#allocation9 + $0x38] sm:$0xff]  ;;  %v306_v45 = vld [vmem:[#allocation9 + $0x30] sm:$0xff] }
  0x4b   :  { %590 = vmatpush3.msra.mxu0 %v123_v10  ;;  %625 = vmatpush3.msra.mxu1 %v215_v17  ;;  %v305_v46 = vld [vmem:[#allocation9 + $0x28] sm:$0xff]  ;;  %v304_v47 = vld [vmem:[#allocation9 + $0x20] sm:$0xff]  ;;  %v303_v48 = vld [vmem:[#allocation9 + $0x18] sm:$0xff] }
  0x4c   :  { %591 = vmatprep.subr.mxu0 %v862_v0  ;;  %626 = vmatprep.subr.mxu1 %v862_v0  ;;  %v302_v51 = vld [vmem:[#allocation9 + $0x10] sm:$0xff]  ;;  %v301_v52 = vld [vmem:[#allocation9 + $0x8] sm:$0xff]  ;;  %v300_v53 = vld [vmem:[#allocation9] sm:$0xff] }
  0x4d   :  { %592 = vmatpush3.msra.mxu0 %v122_v12  ;;  %627 = vmatpush3.msra.mxu1 %v214_v19  ;;  %v409_v54 = vld [vmem:[#allocation11 + $0x78] sm:$0xff]  ;;  %v408_v55 = vld [vmem:[#allocation11 + $0x70] sm:$0xff]  ;;  %v407_v56 = vld [vmem:[#allocation11 + $0x68] sm:$0xff] }
  0x4e   :  { %593 = vmatprep.subr.mxu0 %v862_v0  ;;  %628 = vmatprep.subr.mxu1 %v862_v0  ;;  %v406_v57 = vld [vmem:[#allocation11 + $0x60] sm:$0xff]  ;;  %v405_v58 = vld [vmem:[#allocation11 + $0x58] sm:$0xff]  ;;  %v404_v59 = vld [vmem:[#allocation11 + $0x50] sm:$0xff] }
  0x4f   :  { %594 = vmatpush3.msra.mxu0 %v121_v14  ;;  %629 = vmatpush3.msra.mxu1 %v213_v21  ;;  %v403_v60 = vld [vmem:[#allocation11 + $0x48] sm:$0xff]  ;;  %v402_v61 = vld [vmem:[#allocation11 + $0x40] sm:$0xff]  ;;  %v401_v62 = vld [vmem:[#allocation11 + $0x38] sm:$0xff] }
  0x50   :  { %595 = vmatprep.subr.mxu0 %v862_v0  ;;  %630 = vmatprep.subr.mxu1 %v862_v0  ;;  %v400_v63 = vld [vmem:[#allocation11 + $0x30] sm:$0xff]  ;;  %v399_v1 = vld [vmem:[#allocation11 + $0x28] sm:$0xff]  ;;  %v398_v2 = vld [vmem:[#allocation11 + $0x20] sm:$0xff] }
  0x51   :  { %596 = vmatpush3.msra.mxu0 %v120_v16  ;;  %631 = vmatpush3.msra.mxu1 %v212_v23  ;;  %v397_v3 = vld [vmem:[#allocation11 + $0x18] sm:$0xff]  ;;  %v396_v9 = vld [vmem:[#allocation11 + $0x10] sm:$0xff]  ;;  %v395_v10 = vld [vmem:[#allocation11 + $0x8] sm:$0xff] }
  0x52   :  { %597 = vmatprep.subr.mxu0 %v862_v0  ;;  %632 = vmatprep.subr.mxu1 %v862_v0  ;;  %v506_v4 = vld [vmem:[%s1033_s4] ss:$0 sm:$0xff]  ;;  %v394_v11 = vld [vmem:[#allocation11] sm:$0xff] }
  0x53   :  { %598 = vmatpush3.msra.mxu0 %v119_v18  ;;  %633 = vmatpush3.msra.mxu1 %v211_v25  ;;  %v507_v12 = vld [vmem:[%s1035_s6] ss:$0 sm:$0xff] }
  0x54   :  { %599 = vmatprep.subr.mxu0 %v862_v0  ;;  %634 = vmatprep.subr.mxu1 %v862_v0  ;;  %v508_v17 = vld [vmem:[%s1037_s8] ss:$0 sm:$0xff] }
  0x55   :  { %600 = vmatpush3.msra.mxu0 %v118_v20  ;;  %635 = vmatpush3.msra.mxu1 %v210_v29 }
  0x56   :  { %601 = vmatprep.subr.mxu0 %v862_v0  ;;  %636 = vmatprep.subr.mxu1 %v862_v0 }
  0x57   :  { %602 = vmatpush3.msra.mxu0 %v117_v22  ;;  %637 = vmatpush3.msra.mxu1 %v209_v32 }
  0x58   :  { %603 = vmatprep.subr.mxu0 %v862_v0  ;;  %638 = vmatprep.subr.mxu1 %v862_v0 }
  0x59   :  { %604 = vmatpush3.msra.mxu0 %v116_v24  ;;  %639 = vmatpush3.msra.mxu1 %v208_v33 }
  0x5a   :  { %605 = vmatprep.subr.mxu0 %v862_v0  ;;  %640 = vmatprep.subr.mxu1 %v862_v0 }
  0x5b   :  { %606 = vmatpush3.msra.mxu0 %v115_v28  ;;  %641 = vmatpush3.msra.mxu1 %v207_v34 }
  0x5c   :  { %607 = vmatprep.subr.mxu0 %v862_v0  ;;  %642 = vmatprep.subr.mxu1 %v862_v0 }
  0x5d   :  { %608 = vmatpush3.msra.mxu0 %v114_v30  ;;  %643 = vmatpush3.msra.mxu1 %v206_v35 }
  0x5e   :  { %610 = vmatmul.mubr.f32.vlgmr.msra.gmra.mxu0 %v112_v31  ;;  %647 = vmatprep.subr.mxu0 %v862_v0 }
  0x5f   :  { %679 = vmatprep.mubr.msk.f32.mxu0 %vm863_vm0, %v862_v0  ;;  %682 = vmatprep.subr.mxu1 %v862_v0 }
  0x60   :  { %648 = vmatpush3.msra.mxu0 %v315_v36 }
  0x61   :  { %649 = vmatprep.subr.mxu0 %v862_v0 }
  0x62   :  { %650 = vmatpush3.msra.mxu0 %v314_v37 }
  0x63   :  { %651 = vmatprep.subr.mxu0 %v862_v0 }
  0x64   :  { %652 = vmatpush3.msra.mxu0 %v313_v38 }
  0x65   :  { %653 = vmatprep.subr.mxu0 %v862_v0 }
  0x66   :  { %654 = vmatpush3.msra.mxu0 %v312_v39 }
  0x67   :  { %655 = vmatprep.subr.mxu0 %v862_v0 }
  0x68   :  { %656 = vmatpush3.msra.mxu0 %v311_v40 }
  0x69   :  { %657 = vmatprep.subr.mxu0 %v862_v0 }
  0x6a   :  { %658 = vmatpush3.msra.mxu0 %v310_v41 }
  0x6b   :  { %659 = vmatprep.subr.mxu0 %v862_v0 }
  0x6c   :  { %660 = vmatpush3.msra.mxu0 %v309_v42 }
  0x6d   :  { %661 = vmatprep.subr.mxu0 %v862_v0 }
  0x6e   :  { %662 = vmatpush3.msra.mxu0 %v308_v43 }
  0x6f   :  { %663 = vmatprep.subr.mxu0 %v862_v0 }
  0x70   :  { %664 = vmatpush3.msra.mxu0 %v307_v44 }
  0x71   :  { %665 = vmatprep.subr.mxu0 %v862_v0 }
  0x72   :  { %666 = vmatpush3.msra.mxu0 %v306_v45 }
  0x73   :  { %667 = vmatprep.subr.mxu0 %v862_v0 }
  0x74   :  { %668 = vmatpush3.msra.mxu0 %v305_v46 }
  0x75   :  { %669 = vmatprep.subr.mxu0 %v862_v0 }
  0x76   :  { %670 = vmatpush3.msra.mxu0 %v304_v47 }
  0x77   :  { %671 = vmatprep.subr.mxu0 %v862_v0 }
  0x78   :  { %672 = vmatpush3.msra.mxu0 %v303_v48 }
  0x79   :  { %673 = vmatprep.subr.mxu0 %v862_v0 }
  0x7a   :  { %674 = vmatpush3.msra.mxu0 %v302_v51 }
  0x7b   :  { %675 = vmatprep.subr.mxu0 %v862_v0 }
  0x7c   :  { %676 = vmatpush3.msra.mxu0 %v301_v52 }
  0x7d   :  { %677 = vmatprep.subr.mxu0 %v862_v0 }
  0x7e   :  { %678 = vmatpush3.msra.mxu0 %v300_v53 }
 0x11e   :  { %v196_v49 = vpop.f32.mrf.mxu0 }
 0x11f   :  { %645 = vmatmul.mubr.f32.vlgmr.msra.gmra.mxu1 %v196_v49 }
 0x120   :  { %v611_v50 = vpop.f32.mrf.mxu0  ;;  %714 = vmatprep.mubr.msk.f32.mxu1 %vm863_vm0, %v862_v0  ;;  %683 = vmatpush3.msra.mxu1 %v409_v54 }
 0x121   :  { %684 = vmatprep.subr.mxu1 %v862_v0 }
 0x122   :  { %685 = vmatpush3.msra.mxu1 %v408_v55 }
 0x123   :  { %686 = vmatprep.subr.mxu1 %v862_v0 }
 0x124   :  { %687 = vmatpush3.msra.mxu1 %v407_v56 }
 0x125   :  { %688 = vmatprep.subr.mxu1 %v862_v0 }
 0x126   :  { %689 = vmatpush3.msra.mxu1 %v406_v57 }
 0x127   :  { %690 = vmatprep.subr.mxu1 %v862_v0 }
 0x128   :  { %691 = vmatpush3.msra.mxu1 %v405_v58 }
 0x129   :  { %692 = vmatprep.subr.mxu1 %v862_v0 }
 0x12a   :  { %693 = vmatpush3.msra.mxu1 %v404_v59 }
 0x12b   :  { %694 = vmatprep.subr.mxu1 %v862_v0 }
 0x12c   :  { %695 = vmatpush3.msra.mxu1 %v403_v60 }
 0x12d   :  { %696 = vmatprep.subr.mxu1 %v862_v0 }
 0x12e   :  { %697 = vmatpush3.msra.mxu1 %v402_v61 }
 0x12f   :  { %698 = vmatprep.subr.mxu1 %v862_v0 }
 0x130   :  { %699 = vmatpush3.msra.mxu1 %v401_v62 }
 0x131   :  { %700 = vmatprep.subr.mxu1 %v862_v0 }
 0x132   :  { %701 = vmatpush3.msra.mxu1 %v400_v63 }
 0x133   :  { %702 = vmatprep.subr.mxu1 %v862_v0 }
 0x134   :  { %703 = vmatpush3.msra.mxu1 %v399_v1 }
 0x135   :  { %704 = vmatprep.subr.mxu1 %v862_v0 }
 0x136   :  { %705 = vmatpush3.msra.mxu1 %v398_v2 }
 0x137   :  { %706 = vmatprep.subr.mxu1 %v862_v0 }
 0x138   :  { %707 = vmatpush3.msra.mxu1 %v397_v3 }
 0x139   :  { %708 = vmatprep.subr.mxu1 %v862_v0 }
 0x13a   :  { %709 = vmatpush3.msra.mxu1 %v396_v9 }
 0x13b   :  { %710 = vmatprep.subr.mxu1 %v862_v0 }
 0x13c   :  { %711 = vmatpush3.msra.mxu1 %v395_v10 }
 0x13d   :  { %712 = vmatprep.subr.mxu1 %v862_v0 }
 0x13e   :  { %713 = vmatpush3.msra.mxu1 %v394_v11 }
 0x1df   :  { %v295_v5 = vpop.f32.mrf.mxu1 }
 0x1e0   :  { %v296_v6 = vadd.f32 %v506_v4, %v295_v5 }
 0x1e1   :  { %v646_v7 = vpop.f32.mrf.mxu1 }
 0x1e2   :  { %v299_v8 = vmax.f32 %v296_v6, 0.0 }
 0x1e4   :  { %680 = vmatmul.mubr.f32.vlgmr.msra.gmra.mxu0 %v299_v8 }
 0x2a4   :  { %v389_v13 = vpop.f32.mrf.mxu0 }
 0x2a5   :  { %v390_v14 = vadd.f32 %v507_v12, %v389_v13 }
 0x2a6   :  { %v681_v15 = vpop.f32.mrf.mxu0 }
 0x2a7   :  { %v393_v16 = vmax.f32 %v390_v14, 0.0 }
 0x2a9   :  { %715 = vmatmul.mubr.f32.vlgmr.msra.gmra.mxu1 %v393_v16 }
 0x369   :  { %v483_v18 = vpop.f32.mrf.mxu1 }
 0x36a   :  { %v484_v19 = vadd.f32 %v508_v17, %v483_v18 }
 0x36b   :  { %v716_v0 = vpop.f32.mrf.mxu1 }
 0x36c   :  { %487 = vst [vmem:[#allocation12] sm:$0xff] %v484_v19 }
 0x36d   :  { %838 = shalt.err (!%p835_p1)
}
 0x36e   :  { %497 = dma.vmem_to_hbm [thread:$0]  %s495_s17, 128, %s1038_s9, [#allocation5]  }
 0x36f   :  { %853 = dma.done.wait [#allocation5], 128  }
 0x370   :  { %854 = vsyncadd [#allocation5], 4294967168 }
 0x371   :  { %501 = vsyncpa [#allocation4], 1 }
 0x372   :  { %502 = vsyncpa [#allocation7], 1 }
 0x373   :  { %503 = vsyncpa [#allocation10], 1 }
 0x374   :  { %504 = vsyncpa [#allocation5], 1 }

</bundles_post_ra>
